<compile_context>
chip_gen: v5e
topology: v5e:2x2
jax: 0.10.0
libtpu: 0.0.40
codegen_flags: <defaults>
</compile_context>

<pallas_src>
import functools
import math

import jax
import jax.numpy as jnp
from jax import lax
from jax.experimental import pallas as pl
from jax.experimental.pallas import tpu as pltpu


# --------------------------------------------------------------------------
# generation-aware tiling / VMEM budget
# --------------------------------------------------------------------------
@functools.lru_cache(maxsize=None)
def _tpu_config():
    """(vmem_limit_bytes, row_tile, col_tile) derived from the local chip.

    v5e / v6e expose 128 MiB of VMEM per TensorCore -> bigger tiles and a
    ~96 MiB scoped budget.  v7x has only 64 MiB per TC (and anything we cannot
    identify) -> conservative 256 x 512 tiles with a 48 MiB budget.
    """
    vmem_bytes = 0
    try:
        vmem_bytes = int(getattr(pltpu.get_tpu_info(), "vmem_capacity_bytes", 0))
    except Exception:
        vmem_bytes = 0
    if vmem_bytes >= 128 * 1024 * 1024:          # v5e / v6e
        return 96 * 1024 * 1024, 512, 1024
    return 48 * 1024 * 1024, 256, 512            # v7x (64 MiB / TC) or unknown


def _round_up(x, m):
    return ((x + m - 1) // m) * m


def _row_tiling(n_rows, row_tile):
    tm = min(row_tile, _round_up(n_rows, 8))
    return tm, _round_up(n_rows, tm)


def _col_tiling(d_out_p, col_tile):
    # d_out_p is always a multiple of 128 (outputs padded lane-dense).
    tn = max(128, (min(col_tile, d_out_p) // 128) * 128)
    while d_out_p % tn:
        tn -= 128
    return tn


def _erf(x):
    # Abramowitz & Stegun 7.1.26 (max abs err ~1.5e-7) => torch's exact-erf GELU
    # semantics.  The 1/(1 + p|x|) divide runs on the EUP (approx reciprocal).
    a1, a2, a3, a4, a5 = 0.254829592, -0.284496736, 1.421413741, -1.453152027, 1.061405429
    p = 0.3275911
    ax = jnp.abs(x)
    t = pl.reciprocal(1.0 + p * ax, approx=True)
    poly = ((((a5 * t + a4) * t + a3) * t + a2) * t + a1) * t
    y = 1.0 - poly * jnp.exp(-ax * ax)
    return jnp.where(x >= 0, y, -y)


def _gelu_exact(x):
    return 0.5 * x * (1.0 + _erf(x * 0.7071067811865476))


# --------------------------------------------------------------------------
# kernels
# --------------------------------------------------------------------------
def _ln_linear_kernel(x_ref, g_ref, b_ref, w_ref, bias_ref, o_ref, y_ref, *, eps, act):
    # x: (TM, D_in) f32; g/b: (1, D_in); w: (D_in, TN); bias: (1, TN); o: (TM, TN)
    # y_ref: (TM, D_in) f32 VMEM scratch caching the normalized tile so LN runs
    # once per row tile (columns are the inner, "arbitrary" grid axis).
    @pl.when(pl.program_id(1) == 0)
    def _():
        x = x_ref[...].astype(jnp.float32)
        mean = jnp.mean(x, axis=-1, keepdims=True)
        xc = x - mean                                     # two-pass variance:
        var = jnp.mean(xc * xc, axis=-1, keepdims=True)   # no E[x^2]-mean^2 cancellation
        y = xc * lax.rsqrt(var + eps)
        y_ref[...] = (y * g_ref[...].astype(jnp.float32)
                      + b_ref[...].astype(jnp.float32))

    acc = jnp.dot(y_ref[...].astype(w_ref.dtype), w_ref[...],
                  preferred_element_type=jnp.float32)
    acc = acc + bias_ref[...].astype(jnp.float32)
    if act == "gelu":
        acc = _gelu_exact(acc)
    o_ref[...] = acc.astype(o_ref.dtype)


def _linear_kernel(*refs, act, has_residual):
    if has_residual:
        x_ref, w_ref, bias_ref, res_ref, o_ref = refs
    else:
        x_ref, w_ref, bias_ref, o_ref = refs
        res_ref = None
    acc = jnp.dot(x_ref[...].astype(w_ref.dtype), w_ref[...],
                  preferred_element_type=jnp.float32)
    acc = acc + bias_ref[...].astype(jnp.float32)
    if act == "gelu":
        acc = _gelu_exact(acc)
    if has_residual:
        acc = acc + res_ref[...].astype(jnp.float32)      # fused residual add
    o_ref[...] = acc.astype(o_ref.dtype)


def _attention_kernel(q_ref, k_ref, v_ref, o_ref, *, heads, dim_head, scale):
    # blocks: (1, N, H*Dh).  One batch element per grid step; all heads are
    # processed inside so the write is a single lane-dense (N, H*Dh) store and
    # the head split/merge transposes disappear from the XLA graph.
    q_all = q_ref[0]
    k_all = k_ref[0]
    v_all = v_ref[0]
    outs = []
    for h in range(heads):                    # static unroll (heads is small)
        lo, hi = h * dim_head, (h + 1) * dim_head
        q = q_all[:, lo:hi] * scale           # fold scale into q (N*Dh, not N*N)
        k = k_all[:, lo:hi]
        v = v_all[:, lo:hi]
        # Contract on Dh directly (no materialized k.T); operands stay in the
        # streamed dtype (bf16 on the fast path) with f32 MXU accumulation.
        s = lax.dot_general(q, k, (((1,), (1,)), ((), ())),
                            preferred_element_type=jnp.float32)
        m = jnp.max(s, axis=-1, keepdims=True)
        p = jnp.exp(s - m)
        denom = jnp.sum(p, axis=-1, keepdims=True)
        attn = p * pl.reciprocal(denom, approx=True)      # EUP divide
        outs.append(jnp.dot(attn.astype(v.dtype), v,
                            preferred_element_type=jnp.float32))
    # TODO(synk): tile the query dimension (flash-style) for long sequences
    # (N >~ 512) to bound vreg pressure of the N x N score tiles.
    o_ref[0] = jnp.concatenate(outs, axis=-1).astype(o_ref.dtype)


# --------------------------------------------------------------------------
# wrappers
# --------------------------------------------------------------------------
def ln_linear(x, gamma, beta, w, bias, *, eps=1e-6, act=None,
              compute_dtype=None, out_dtype=None):
    """Fused y = act(LayerNorm(x) @ w + bias).  x: [..., D_in], w: [D_in, D_out].

    x is streamed in its original dtype (f32) so LN statistics stay exact; only
    the normalized activations and the weights use `compute_dtype` on the MXU.
    """
    vmem_limit, row_tile, col_tile = _tpu_config()
    orig_shape = x.shape
    if out_dtype is None:
        out_dtype = x.dtype
    d_in, d_out = w.shape
    d_out_p = _round_up(d_out, 128)                 # lane-dense output stores
    x2 = x.reshape(-1, d_in)
    R = x2.shape[0]
    tm, Rp = _row_tiling(R, row_tile)
    tn = _col_tiling(d_out_p, col_tile)
    if Rp != R:
        x2 = jnp.pad(x2, ((0, Rp - R), (0, 0)))
    if compute_dtype is not None:
        w = w.astype(compute_dtype)
    if d_out_p != d_out:
        w = jnp.pad(w, ((0, 0), (0, d_out_p - d_out)))
        bias = jnp.pad(bias, ((0, d_out_p - d_out),))
    g2 = gamma.reshape(1, d_in).astype(jnp.float32)
    b2 = beta.reshape(1, d_in).astype(jnp.float32)
    bias2 = bias.reshape(1, d_out_p).astype(jnp.float32)

    w_bytes = jnp.dtype(w.dtype).itemsize
    cost = pl.CostEstimate(
        flops=2 * Rp * d_in * d_out_p,
        transcendentals=Rp * (d_out_p if act == "gelu" else 1),
        bytes_accessed=(Rp * d_in * 4
                        + (Rp // tm) * d_in * d_out_p * w_bytes
                        + Rp * d_out_p * jnp.dtype(out_dtype).itemsize),
    )
    out = pl.pallas_call(
        functools.partial(_ln_linear_kernel, eps=eps, act=act),
        out_shape=jax.ShapeDtypeStruct((Rp, d_out_p), out_dtype),
        grid_spec=pltpu.PrefetchScalarGridSpec(
            num_scalar_prefetch=0,
            # rows outer ("parallel" -> megacore); columns inner ("arbitrary")
            # so the LN scratch written at j == 0 is valid for every column step.
            grid=(Rp // tm, d_out_p // tn),
            in_specs=[
                pl.BlockSpec((tm, d_in), lambda i, j: (i, 0)),
                pl.BlockSpec((1, d_in), lambda i, j: (0, 0)),
                pl.BlockSpec((1, d_in), lambda i, j: (0, 0)),
                pl.BlockSpec((d_in, tn), lambda i, j: (0, j)),
                pl.BlockSpec((1, tn), lambda i, j: (0, j)),
            ],
            out_specs=pl.BlockSpec((tm, tn), lambda i, j: (i, j)),
            scratch_shapes=[pltpu.VMEM((tm, d_in), jnp.float32)],
        ),
        compiler_params=pltpu.CompilerParams(
            dimension_semantics=("parallel", "arbitrary"),
            vmem_limit_bytes=vmem_limit,
        ),
        cost_estimate=cost,
    )(x2, g2, b2, w, bias2)
    if Rp != R or d_out_p != d_out:
        out = out[:R, :d_out]
    return out.reshape(orig_shape[:-1] + (d_out,))


def linear(x, w, bias, *, act=None, residual=None, compute_dtype=None,
           out_dtype=None):
    """y = act(x @ w + bias) [+ residual].  x: [..., D_in], w: [D_in, D_out]."""
    # TODO(synk): add a K-axis f32 accumulator (extra "arbitrary" grid axis +
    # VMEM scratch) once d_in exceeds ~4K (ViT-H MLP down-projection).
    vmem_limit, row_tile, col_tile = _tpu_config()
    orig_shape = x.shape
    d_in, d_out = w.shape
    if out_dtype is None:
        out_dtype = residual.dtype if residual is not None else x.dtype
    d_out_p = _round_up(d_out, 128)
    x2 = x.reshape(-1, d_in)
    R = x2.shape[0]
    tm, Rp = _row_tiling(R, row_tile)
    tn = _col_tiling(d_out_p, col_tile)
    if Rp != R:
        x2 = jnp.pad(x2, ((0, Rp - R), (0, 0)))
    if compute_dtype is not None:
        w = w.astype(compute_dtype)
    if d_out_p != d_out:
        w = jnp.pad(w, ((0, 0), (0, d_out_p - d_out)))
        bias = jnp.pad(bias, ((0, d_out_p - d_out),))
    bias2 = bias.reshape(1, d_out_p).astype(jnp.float32)

    inputs = [x2, w, bias2]
    in_specs = [
        pl.BlockSpec((tm, d_in), lambda i, j: (i, 0)),
        pl.BlockSpec((d_in, tn), lambda i, j: (0, j)),
        pl.BlockSpec((1, tn), lambda i, j: (0, j)),
    ]
    has_residual = residual is not None
    if has_residual:
        r2 = residual.reshape(-1, d_out).astype(jnp.float32)
        if Rp != R:
            r2 = jnp.pad(r2, ((0, Rp - R), (0, 0)))
        if d_out_p != d_out:
            r2 = jnp.pad(r2, ((0, 0), (0, d_out_p - d_out)))
        inputs.append(r2)
        in_specs.append(pl.BlockSpec((tm, tn), lambda i, j: (i, j)))

    x_bytes = jnp.dtype(x2.dtype).itemsize
    w_bytes = jnp.dtype(w.dtype).itemsize
    cost = pl.CostEstimate(
        flops=2 * Rp * d_in * d_out_p,
        transcendentals=Rp * (d_out_p if act == "gelu" else 0),
        bytes_accessed=(Rp * d_in * x_bytes
                        + (Rp // tm) * d_in * d_out_p * w_bytes
                        + (2 if has_residual else 1) * Rp * d_out_p
                        * jnp.dtype(out_dtype).itemsize),
    )
    out = pl.pallas_call(
        functools.partial(_linear_kernel, act=act, has_residual=has_residual),
        out_shape=jax.ShapeDtypeStruct((Rp, d_out_p), out_dtype),
        grid_spec=pltpu.PrefetchScalarGridSpec(
            num_scalar_prefetch=0,
            grid=(Rp // tm, d_out_p // tn),
            in_specs=in_specs,
            out_specs=pl.BlockSpec((tm, tn), lambda i, j: (i, j)),
        ),
        compiler_params=pltpu.CompilerParams(
            dimension_semantics=("parallel", "parallel"),
            vmem_limit_bytes=vmem_limit,
        ),
        cost_estimate=cost,
    )(*inputs)
    if Rp != R or d_out_p != d_out:
        out = out[:R, :d_out]
    return out.reshape(orig_shape[:-1] + (d_out,))


def multi_head_attention(q, k, v, *, heads, dim_head, scale):
    """q, k, v: [B, N, H*Dh] (packed heads) -> softmax(q k^T * scale) v, same layout."""
    vmem_limit, _, _ = _tpu_config()
    B, N, inner = q.shape
    spec = pl.BlockSpec((1, N, inner), lambda i: (i, 0, 0))
    out = pl.pallas_call(
        functools.partial(_attention_kernel, heads=heads, dim_head=dim_head,
                          scale=scale),
        out_shape=jax.ShapeDtypeStruct((B, N, inner), q.dtype),
        grid_spec=pltpu.PrefetchScalarGridSpec(
            num_scalar_prefetch=0,
            grid=(B,),
            in_specs=[spec, spec, spec],
            out_specs=spec,
        ),
        compiler_params=pltpu.CompilerParams(
            dimension_semantics=("parallel",),
            vmem_limit_bytes=vmem_limit,
        ),
    )(q, k, v)
    return out


# --------------------------------------------------------------------------
# ViT forward (Pallas path)
# --------------------------------------------------------------------------
def attention_block(x, p, *, heads, dim_head, compute_dtype):
    """x + PreNorm(Attention)(x), residual fused into the out-projection."""
    qkv = ln_linear(x, p["ln_g"], p["ln_b"], p["w_qkv"], p["b_qkv"],
                    compute_dtype=compute_dtype, out_dtype=compute_dtype)
    q, k, v = jnp.split(qkv, 3, axis=-1)          # stays in (B, N, H*Dh) layout
    o = multi_head_attention(q, k, v, heads=heads, dim_head=dim_head,
                             scale=dim_head ** -0.5)
    return linear(o, p["w_out"], p["b_out"], residual=x,
                  compute_dtype=compute_dtype)     # to_out (dropout p=0)


def feedforward_block(x, p, *, compute_dtype):
    """x + PreNorm(FeedForward)(x), residual fused into linear2."""
    h = ln_linear(x, p["ln_g"], p["ln_b"], p["w1"], p["b1"], act="gelu",
                  compute_dtype=compute_dtype, out_dtype=compute_dtype)
    return linear(h, p["w2"], p["b2"], residual=x, compute_dtype=compute_dtype)


def vit_forward(img, params, *, patch_size, heads, dim_head, pool="cls",
                compute_dtype=None):
    if compute_dtype is None:
        compute_dtype = jnp.bfloat16   # native MXU operand format on v5e/v6e/v7x
    p1, p2 = patch_size
    B, C, H, W = img.shape
    gh, gw = H // p1, W // p2
    # Rearrange('b c (h p1) (w p2) -> b (h w) (p1 p2 c)')
    x = img.reshape(B, C, gh, p1, gw, p2).transpose(0, 2, 4, 3, 5, 1)
    x = x.reshape(B, gh * gw, p1 * p2 * C)
    x = linear(x, params["patch_w"], params["patch_b"],
               compute_dtype=compute_dtype)                 # patch embedding (f32 out)
    b, n, d = x.shape
    cls = jnp.broadcast_to(params["cls_token"], (b, 1, d)).astype(x.dtype)
    x = jnp.concatenate([cls, x], axis=1)
    x = x + params["pos_embedding"][:, : n + 1]
    # emb_dropout / dropout are identity at inference (p = 0).
    for layer in params["layers"]:
        x = attention_block(x, layer["attn"], heads=heads, dim_head=dim_head,
                            compute_dtype=compute_dtype)
        x = feedforward_block(x, layer["ff"], compute_dtype=compute_dtype)
    x = jnp.mean(x, axis=1) if pool == "mean" else x[:, 0]
    # mlp_head = LayerNorm + Linear, fused; logits kept in f32.
    return ln_linear(x, params["head_ln_g"], params["head_ln_b"],
                     params["head_w"], params["head_b"],
                     compute_dtype=compute_dtype)


# --------------------------------------------------------------------------
# pure-JAX reference (mirrors the PyTorch module)
# --------------------------------------------------------------------------
def _ref_layernorm(x, g, b, eps=1e-6):
    mean = jnp.mean(x, axis=-1, keepdims=True)
    var = jnp.mean((x - mean) ** 2, axis=-1, keepdims=True)
    return (x - mean) / jnp.sqrt(var + eps) * g + b


def ref_vit(img, params, *, patch_size, heads, dim_head, pool="cls"):
    p1, p2 = patch_size
    B, C, H, W = img.shape
    gh, gw = H // p1, W // p2
    x = img.reshape(B, C, gh, p1, gw, p2).transpose(0, 2, 4, 3, 5, 1)
    x = x.reshape(B, gh * gw, p1 * p2 * C)
    x = x @ params["patch_w"] + params["patch_b"]
    b, n, d = x.shape
    cls = jnp.broadcast_to(params["cls_token"], (b, 1, d))
    x = jnp.concatenate([cls, x], axis=1)
    x = x + params["pos_embedding"][:, : n + 1]
    for layer in params["layers"]:
        pa = layer["attn"]
        hx = _ref_layernorm(x, pa["ln_g"], pa["ln_b"])
        qkv = hx @ pa["w_qkv"] + pa["b_qkv"]
        q, k, v = jnp.split(qkv, 3, axis=-1)

        def to_heads(t):
            return t.reshape(b, n + 1, heads, dim_head).transpose(0, 2, 1, 3)

        q, k, v = to_heads(q), to_heads(k), to_heads(v)
        dots = jnp.einsum("bhid,bhjd->bhij", q, k) * (dim_head ** -0.5)
        attn = jax.nn.softmax(dots, axis=-1)
        o = jnp.einsum("bhij,bhjd->bhid", attn, v)
        o = o.transpose(0, 2, 1, 3).reshape(b, n + 1, heads * dim_head)
        x = (o @ pa["w_out"] + pa["b_out"]) + x
        pf = layer["ff"]
        hx = _ref_layernorm(x, pf["ln_g"], pf["ln_b"])
        hx = jax.nn.gelu(hx @ pf["w1"] + pf["b1"], approximate=False)
        x = (hx @ pf["w2"] + pf["b2"]) + x
    x = jnp.mean(x, axis=1) if pool == "mean" else x[:, 0]
    hx = _ref_layernorm(x, params["head_ln_g"], params["head_ln_b"])
    return hx @ params["head_w"] + params["head_b"]


# --------------------------------------------------------------------------
# parameter init
# --------------------------------------------------------------------------
def _init_linear(key, d_in, d_out):
    kw, kb = jax.random.split(key)
    bound = 1.0 / math.sqrt(d_in)
    w = jax.random.uniform(kw, (d_in, d_out), jnp.float32, -bound, bound)
    b = jax.random.uniform(kb, (d_out,), jnp.float32, -bound, bound)
    return w, b


def _init_layernorm(key, d):
    kg, kb = jax.random.split(key)
    g = 1.0 + 0.1 * jax.random.normal(kg, (d,), jnp.float32)
    b = 0.1 * jax.random.normal(kb, (d,), jnp.float32)
    return g, b


def init_vit_params(key, *, image_size, patch_size, channels, dim, depth,
                    heads, dim_head, mlp_dim, num_classes):
    ih, iw = image_size
    p1, p2 = patch_size
    num_patches = (ih // p1) * (iw // p2)
    patch_dim = channels * p1 * p2
    inner = heads * dim_head
    keys = jax.random.split(key, 6 + depth)
    patch_w, patch_b = _init_linear(keys[0], patch_dim, dim)
    pos_embedding = jax.random.normal(keys[1], (1, num_patches + 1, dim), jnp.float32)
    cls_token = jax.random.normal(keys[2], (1, 1, dim), jnp.float32)
    layers = []
    for i in range(depth):
        lk = jax.random.split(keys[6 + i], 6)
        a_ln_g, a_ln_b = _init_layernorm(lk[0], dim)
        w_qkv, b_qkv = _init_linear(lk[1], dim, inner * 3)
        w_out, b_out = _init_linear(lk[2], inner, dim)
        f_ln_g, f_ln_b = _init_layernorm(lk[3], dim)
        w1, b1 = _init_linear(lk[4], dim, mlp_dim)
        w2, b2 = _init_linear(lk[5], mlp_dim, dim)
        layers.append({
            "attn": {"ln_g": a_ln_g, "ln_b": a_ln_b,
                     "w_qkv": w_qkv, "b_qkv": b_qkv,
                     "w_out": w_out, "b_out": b_out},
            "ff": {"ln_g": f_ln_g, "ln_b": f_ln_b,
                   "w1": w1, "b1": b1, "w2": w2, "b2": b2},
        })
    head_ln_g, head_ln_b = _init_layernorm(keys[3], dim)
    head_w, head_b = _init_linear(keys[4], dim, num_classes)
    return {
        "patch_w": patch_w, "patch_b": patch_b,
        "pos_embedding": pos_embedding, "cls_token": cls_token,
        "layers": layers,
        "head_ln_g": head_ln_g, "head_ln_b": head_ln_b,
        "head_w": head_w, "head_b": head_b,
    }


# --------------------------------------------------------------------------
# test
# --------------------------------------------------------------------------
if __name__ == "__main__":
    image_size = (16, 16)
    patch_size = (4, 4)
    channels = 3
    dim = 32
    depth = 2
    heads = 4
    dim_head = 8
    mlp_dim = 64
    num_classes = 10
    B = 2

    key = jax.random.PRNGKey(0)
    kp, ki = jax.random.split(key)
    params = init_vit_params(kp, image_size=image_size, patch_size=patch_size,
                             channels=channels, dim=dim, depth=depth, heads=heads,
                             dim_head=dim_head, mlp_dim=mlp_dim,
                             num_classes=num_classes)
    img = jax.random.normal(ki, (B, channels) + image_size, jnp.float32)

    with jax.default_matmul_precision("float32"):
        ref = ref_vit(img, params, patch_size=patch_size, heads=heads,
                      dim_head=dim_head, pool="cls")
    ref = jax.block_until_ready(ref)

    # Exact path: f32 operands everywhere -> tight check vs the reference.
    out_f32 = vit_forward(img, params, patch_size=patch_size, heads=heads,
                          dim_head=dim_head, pool="cls",
                          compute_dtype=jnp.float32)
    out_f32 = jax.block_until_ready(out_f32)
    assert out_f32.shape == (B, num_classes)
    assert jnp.allclose(out_f32, ref, atol=2e-2, rtol=2e-2), (
        float(jnp.max(jnp.abs(out_f32 - ref))))

    # Fast path (default): bf16 MXU operands, f32 accumulation / LN stats /
    # residual stream.  Looser check (bf16 quantization of the operands).
    out_bf16 = vit_forward(img, params, patch_size=patch_size, heads=heads,
                           dim_head=dim_head, pool="cls")
    out_bf16 = jax.block_until_ready(out_bf16)
    assert out_bf16.shape == (B, num_classes)
    assert bool(jnp.all(jnp.isfinite(out_bf16)))
    assert float(jnp.max(jnp.abs(out_bf16.astype(jnp.float32) - ref))) < 0.5

    print("KERNEL_OK")
</pallas_src>

<mosaic_0001>
module attributes {stable_mosaic.version = 11 : i64} {
  func.func @_linear_kernel(%arg0: i32, %arg1: i32, %arg2: memref<32x48xf32, #tpu.memory_space<vmem>>, %arg3: memref<48x128xf32, #tpu.memory_space<vmem>>, %arg4: memref<1x128xf32, #tpu.memory_space<vmem>>, %arg5: memref<32x128xf32, #tpu.memory_space<vmem>>) attributes {dimension_semantics = [#tpu.dimension_semantics<parallel>, #tpu.dimension_semantics<parallel>], iteration_bounds = array<i64: 1, 1>, scalar_prefetch = 0 : i64, scratch_operands = 0 : i64, tpu.core_type = #tpu.core_type<tc>, window_params = [{transform_indices = @transform_0, window_bounds = array<i64: 32, 48>}, {transform_indices = @transform_1, window_bounds = array<i64: 48, 128>}, {transform_indices = @transform_2, window_bounds = array<i64: 1, 128>}, {transform_indices = @transform_3, window_bounds = array<i64: 32, 128>}]} {
    %c0 = arith.constant 0 : index
    %c0_0 = arith.constant 0 : index
    %0 = vector.load %arg2[%c0, %c0_0] : memref<32x48xf32, #tpu.memory_space<vmem>>, vector<32x48xf32>
    %c0_1 = arith.constant 0 : index
    %c0_2 = arith.constant 0 : index
    %1 = vector.load %arg3[%c0_1, %c0_2] : memref<48x128xf32, #tpu.memory_space<vmem>>, vector<48x128xf32>
    %cst = arith.constant dense<0.000000e+00> : vector<32x128xf32>
    %2 = tpu.matmul %0, %1, %cst {dimension_numbers = #tpu.dot_dimension_numbers<[1], [0], [0], [1], [0, 0, 1, 1], [], []>} : vector<32x48xf32>, vector<48x128xf32>, vector<32x128xf32> -> vector<32x128xf32>
    %c0_3 = arith.constant 0 : index
    %c0_4 = arith.constant 0 : index
    %3 = vector.load %arg4[%c0_3, %c0_4] : memref<1x128xf32, #tpu.memory_space<vmem>>, vector<1x128xf32>
    %4 = vector.broadcast %3 : vector<1x128xf32> to vector<32x128xf32>
    %5 = arith.addf %2, %4 : vector<32x128xf32>
    %c0_5 = arith.constant 0 : index
    %c0_6 = arith.constant 0 : index
    %6 = vector.load %arg5[%c0_5, %c0_6] : memref<32x128xf32, #tpu.memory_space<vmem>>, vector<32x128xf32>
    tpu.vector_store %arg5[%c0_5, %c0_6], %5 {strides = array<i32>} : memref<32x128xf32, #tpu.memory_space<vmem>>, vector<32x128xf32>,
    return
  }
  func.func @transform_0(%arg0: i32, %arg1: i32) -> (i32, i32) {
    %c0_i32 = arith.constant 0 : i32
    %c0_i32_0 = arith.constant 0 : i32
    return %arg0, %c0_i32 : i32, i32
  }
  func.func @transform_1(%arg0: i32, %arg1: i32) -> (i32, i32) {
    %c0_i32 = arith.constant 0 : i32
    %c0_i32_0 = arith.constant 0 : i32
    return %c0_i32, %arg1 : i32, i32
  }
  func.func @transform_2(%arg0: i32, %arg1: i32) -> (i32, i32) {
    %c0_i32 = arith.constant 0 : i32
    %c0_i32_0 = arith.constant 0 : i32
    return %c0_i32, %arg1 : i32, i32
  }
  func.func @transform_3(%arg0: i32, %arg1: i32) -> (i32, i32) {
    %c0_i32 = arith.constant 0 : i32
    return %arg0, %arg1 : i32, i32
  }
}

</mosaic_0001>

<bundles_post_ra>
// kernel: tpu_custom_call.1
= control target key start
LH: loop header
LB: loop body
LE: loop exit
PB: predicated region body
PF: predicated region fallthrough
CT: control target
= control target key end

     0   :  { %8 = vsyncpa [#allocation3], 0  ;;  %s279_s0 = inlined_call_operand.hbm [shape: f32[32,48], index: 0, kind: input, shape index: {}]   ;;  %s280_s1 = inlined_call_operand.hbm [shape: f32[48,128], index: 1, kind: input, shape index: {}]   ;;  %s281_s2 = inlined_call_operand.vmem [shape: f32[1,128], index: 2, kind: input, shape index: {}]   ;;  %s282_s3 = inlined_call_operand.hbm [shape: f32[32,128], index: 3, kind: output, shape index: {}]  }
   0x1   :  { %9 = vsyncpa [#allocation6], 0 }
   0x2   :  { %10 = vsyncpa [#allocation4], 0  ;;  %s15_s14 = sshll.u32 %s279_s0, 4  ;;  %s233_s15 = smov [#allocation2]   ;;  %s16_s14 = int_to_ptr.hbm [resolvable:$true] %s15_s14 }
   0x3   :  { %s17_s16 = sshll.u32 %s233_s15, 4  ;;  %s28_s19 = sshll.u32 %s280_s1, 4  ;;  %s18_s16 = int_to_ptr.vmem [resolvable:$true] %s17_s16  ;;  %s29_s19 = int_to_ptr.hbm [resolvable:$true] %s28_s19 }
   0x4   :  { %s234_s20 = smov 128   ;;  %s235_s21 = smov 8  }
   0x5   :  { %23 = dma.hbm_to_vmem [thread:$0]  %s16_s14, 512, %s18_s16, [#allocation3], %s234_s20, %s234_s20, %s235_s21  }
   0x6   :  { %s236_s22 = smov [#allocation5]  }
   0x7   :  { %s30_s23 = sshll.u32 %s236_s22, 4  ;;  %s31_s23 = int_to_ptr.vmem [resolvable:$true] %s30_s23 }
   0x8   :  { %36 = dma.hbm_to_vmem [thread:$0]  %s29_s19, 768, %s31_s23, [#allocation6], %s234_s20, %s234_s20, %s235_s21  }
   0x9   :  { %227 = dma.done.wait [#allocation3], 512  }
   0xa   :  { %228 = vsyncadd [#allocation3], 4294966784 }
   0xb   :  { %229 = dma.done.wait [#allocation6], 768  }
   0xc   :  { %230 = vsyncadd [#allocation6], 4294966528  ;;  %v56_v0 = vld [vmem:[#allocation5 + $0x28] sm:$0xff]  ;;  %v55_v1 = vld [vmem:[#allocation5 + $0x20] sm:$0xff]  ;;  %vm61_vm0 = vcmask 392192   ;;  %s237_s24 = smov [#allocation7]  }
   0xd   :  { %132 = vmatpush.msra.mxu2 %v56_v0  ;;  %133 = vmatpush.msra.mxu3 %v56_v0  ;;  %v54_v2 = vld [vmem:[#allocation5 + $0x18] sm:$0xff]  ;;  %v53_v3 = vld [vmem:[#allocation5 + $0x10] sm:$0xff]  ;;  %v52_v4 = vld [vmem:[#allocation5 + $0x8] sm:$0xff]  ;;  %s111_s25 = sshll.u32 %s237_s24, 4  ;;  %s113_s28 = sshll.u32 %s282_s3, 4  ;;  %s112_s25 = int_to_ptr.vmem [resolvable:$true] %s111_s25  ;;  %s114_s28 = int_to_ptr.hbm [resolvable:$true] %s113_s28 }
   0xe   :  { %84 = vmatpush.msra.mxu0 %v56_v0  ;;  %131 = vmatpush.msra.mxu1 %v56_v0  ;;  %v51_v5 = vld [vmem:[#allocation5] sm:$0xff]  ;;  %v49_v6 = vld [vmem:[#allocation2 + $0x10] sm:$0xff]  ;;  %v50_v7 = vld [vmem:[#allocation2 + $0x18] sm:$0xff] }
   0xf   :  { %135 = vmatpush.msra.mxu2 %v55_v1  ;;  %136 = vmatpush.msra.mxu3 %v55_v1  ;;  %v47_v8 = vld [vmem:[#allocation2] sm:$0xff]  ;;  %v48_v9 = vld [vmem:[#allocation2 + $0x8] sm:$0xff] }
  0x10   :  { %85 = vmatpush.msra.mxu0 %v55_v1  ;;  %134 = vmatpush.msra.mxu1 %v55_v1  ;;  %v154_v10 = vld [vmem:[%s281_s2] ss:$0 sm:$0xff] }
  0x11   :  { %138 = vmatpush.msra.mxu2 %v54_v2  ;;  %139 = vmatpush.msra.mxu3 %v54_v2 }
  0x12   :  { %86 = vmatpush.msra.mxu0 %v54_v2  ;;  %137 = vmatpush.msra.mxu1 %v54_v2 }
  0x13   :  { %141 = vmatpush.msra.mxu2 %v53_v3  ;;  %142 = vmatpush.msra.mxu3 %v53_v3 }
  0x14   :  { %87 = vmatpush.msra.mxu0 %v53_v3  ;;  %140 = vmatpush.msra.mxu1 %v53_v3 }
  0x15   :  { %144 = vmatpush.msra.mxu2 %v52_v4  ;;  %145 = vmatpush.msra.mxu3 %v52_v4 }
  0x16   :  { %88 = vmatpush.msra.mxu0 %v52_v4  ;;  %143 = vmatpush.msra.mxu1 %v52_v4 }
  0x17   :  { %147 = vmatpush.msra.mxu2 %v51_v5  ;;  %148 = vmatpush.msra.mxu3 %v51_v5 }
  0x18   :  { %129 = vmatmul.msk.f32.vlgmr.msra.gmra.mxu2 %vm61_vm0, %v49_v6  ;;  %130 = vmatmul.msk.f32.vlgmr.msra.gmra.mxu3 %vm61_vm0, %v50_v7 }
  0x19   :  { %89 = vmatpush.msra.mxu0 %v51_v5  ;;  %146 = vmatpush.msra.mxu1 %v51_v5 }
  0x1a   :  { %127 = vmatmul.msk.f32.vlgmr.msra.gmra.mxu0 %vm61_vm0, %v47_v8  ;;  %128 = vmatmul.msk.f32.vlgmr.msra.gmra.mxu1 %vm61_vm0, %v48_v9 }
  0x97   :  { %v91_v11 = vpop.f32.mrf.mxu0  ;;  %v94_v12 = vpop.f32.mrf.mxu1 }
  0x98   :  { %v92_v13 = vadd.f32 %v154_v10, %v91_v11  ;;  %v95_v14 = vadd.f32 %v154_v10, %v94_v12 }
  0x9a   :  { %103 = vst [vmem:[#allocation7] sm:$0xff] %v92_v13 }
  0x9b   :  { %104 = vst [vmem:[#allocation7 + $0x8] sm:$0xff] %v95_v14  ;;  %v97_v15 = vpop.f32.mrf.mxu2  ;;  %v100_v16 = vpop.f32.mrf.mxu3 }
  0x9c   :  { %v98_v17 = vadd.f32 %v154_v10, %v97_v15  ;;  %v101_v18 = vadd.f32 %v154_v10, %v100_v16 }
  0x9e   :  { %105 = vst [vmem:[#allocation7 + $0x10] sm:$0xff] %v98_v17 }
  0x9f   :  { %106 = vst [vmem:[#allocation7 + $0x18] sm:$0xff] %v101_v18 }
  0xa0   :  { %119 = dma.vmem_to_hbm [thread:$0]  %s112_s25, 512, %s114_s28, [#allocation4], %s234_s20, %s234_s20, %s235_s21  }
  0xa1   :  { %231 = dma.done.wait [#allocation4], 512  }
  0xa2   :  { %232 = vsyncadd [#allocation4], 4294966784 }
  0xa3   :  { %124 = vsyncpa [#allocation3], 1 }
  0xa4   :  { %125 = vsyncpa [#allocation6], 1 }
  0xa5   :  { %126 = vsyncpa [#allocation4], 1 }

</bundles_post_ra>
